<compile_context>
chip_gen: v6e
topology: v6e:2x2x1
jax: 0.10.0
libtpu: 0.0.40
codegen_flags: <defaults>
</compile_context>

<pallas_src>
import jax
import jax.numpy as jnp
import numpy as np
from jax.experimental import pallas as pl
from jax.experimental.pallas import tpu as pltpu


def _make_kernel(TB, L, C, k, s, p, L_out):
    """Kernel closure over the static shape/pooling parameters."""
    def kernel(x_ref, o_ref):
        x = x_ref[...]                                        # (TB, L, C)

        # Replicate-pad the time axis inside the kernel (VMEM only, no HBM copy).
        if p > 0:
            front = jnp.broadcast_to(x[:, 0:1, :], (TB, p, C))
            end = jnp.broadcast_to(x[:, L - 1:L, :], (TB, p, C))
            xpad = jnp.concatenate([front, x, end], axis=1)   # (TB, L+2p, C)
        else:
            xpad = x

        # AvgPool1d(kernel=k, stride=s) as k shifted VPU adds (no MXU).
        span = (L_out - 1) * s + 1
        if s == 1:
            acc = xpad[:, 0:L_out, :].astype(jnp.float32)
            for j in range(1, k):
                acc = acc + xpad[:, j:j + L_out, :].astype(jnp.float32)
        else:
            acc = xpad[:, 0:span:s, :].astype(jnp.float32)
            for j in range(1, k):
                acc = acc + xpad[:, j:j + span:s, :].astype(jnp.float32)

        o_ref[...] = (acc * (1.0 / k)).astype(o_ref.dtype)
    return kernel


def moving_avg_forward(x, kernel_size, stride, batch_block=None):
    """x: (B, L, C) -> (B, L_out, C), matching torch moving_avg.forward."""
    B, L, C = x.shape
    k = int(kernel_size)
    s = int(stride)
    p = (k - 1) // 2
    Lp = L + 2 * p
    assert Lp >= k, "sequence too short for this kernel_size"
    L_out = (Lp - k) // s + 1

    if batch_block is None:
        # Rough per-batch-row VMEM footprint: x block + padded copy + accumulator.
        bytes_per_b = (L + Lp + L_out) * C * x.dtype.itemsize
        budget = 8 * 1024 * 1024        # leaves headroom under the scoped VMEM limit
        tb = max(1, min(B, budget // max(bytes_per_b, 1)))
        # Keep >= 2 grid steps when possible so v7x can shard across its 2 TCs.
        if B >= 2 and pl.cdiv(B, tb) < 2:
            tb = pl.cdiv(B, 2)
    else:
        tb = int(batch_block)
    grid = (pl.cdiv(B, tb),)

    out = pl.pallas_call(
        _make_kernel(tb, L, C, k, s, p, L_out),
        out_shape=jax.ShapeDtypeStruct((B, L_out, C), x.dtype),
        grid=grid,
        in_specs=[pl.BlockSpec((tb, L, C), lambda b: (b, 0, 0))],
        out_specs=pl.BlockSpec((tb, L_out, C), lambda b: (b, 0, 0)),
        compiler_params=pltpu.CompilerParams(
            dimension_semantics=("parallel",)),
    )(x)
    return out


def reference(x, kernel_size, stride):
    """Plain-JAX reference reproducing the PyTorch forward."""
    p = (kernel_size - 1) // 2
    front = jnp.repeat(x[:, 0:1, :], p, axis=1)
    end = jnp.repeat(x[:, -1:, :], p, axis=1)
    xp = jnp.concatenate([front, x, end], axis=1)
    L_out = (xp.shape[1] - kernel_size) // stride + 1
    wins = [xp[:, t * stride:t * stride + kernel_size, :].mean(axis=1)
            for t in range(L_out)]
    return jnp.stack(wins, axis=1)


if __name__ == "__main__":
    # Small deterministic shapes: B=4, seq=16, channels=8, kernel_size=7, stride=1.
    B, L, C = 4, 16, 8
    kernel_size, stride = 7, 1

    key = jax.random.PRNGKey(0)
    x = jax.random.normal(key, (B, L, C), jnp.float32)

    y = moving_avg_forward(x, kernel_size, stride)
    y = jax.block_until_ready(y)

    y_ref = reference(x, kernel_size, stride)
    np.testing.assert_allclose(np.asarray(y), np.asarray(y_ref),
                               rtol=1e-5, atol=1e-5)
    print("KERNEL_OK")
</pallas_src>

<mosaic_0001>
module attributes {stable_mosaic.version = 11 : i64} {
  func.func @kernel(%arg0: i32, %arg1: memref<2x16x8xf32, #tpu.memory_space<vmem>>, %arg2: memref<2x16x8xf32, #tpu.memory_space<vmem>>) attributes {dimension_semantics = [#tpu.dimension_semantics<parallel>], iteration_bounds = array<i64: 2>, scalar_prefetch = 0 : i64, scratch_operands = 0 : i64, tpu.core_type = #tpu.core_type<tc>, window_params = [{transform_indices = @transform_0, window_bounds = array<i64: 2, 16, 8>}, {transform_indices = @transform_1, window_bounds = array<i64: 2, 16, 8>}]} {
    %c0 = arith.constant 0 : index
    %c0_0 = arith.constant 0 : index
    %c0_1 = arith.constant 0 : index
    %0 = vector.load %arg1[%c0, %c0_0, %c0_1] : memref<2x16x8xf32, #tpu.memory_space<vmem>>, vector<2x16x8xf32>
    %1 = vector.extract_strided_slice %0 {offsets = [0, 0, 0], sizes = [2, 1, 8], strides = [1, 1, 1]} : vector<2x16x8xf32> to vector<2x1x8xf32>
    %2 = vector.shape_cast %1 : vector<2x1x8xf32> to vector<2x1x8xf32>
    %3 = vector.broadcast %2 : vector<2x1x8xf32> to vector<2x3x8xf32>
    %4 = vector.extract_strided_slice %0 {offsets = [0, 15, 0], sizes = [2, 1, 8], strides = [1, 1, 1]} : vector<2x16x8xf32> to vector<2x1x8xf32>
    %5 = vector.shape_cast %4 : vector<2x1x8xf32> to vector<2x1x8xf32>
    %6 = vector.broadcast %5 : vector<2x1x8xf32> to vector<2x3x8xf32>
    %7 = tpu.concatenate %3, %0, %6 in 1 : vector<2x3x8xf32>, vector<2x16x8xf32>, vector<2x3x8xf32> -> vector<2x22x8xf32>
    %8 = vector.extract_strided_slice %7 {offsets = [0, 0, 0], sizes = [2, 16, 8], strides = [1, 1, 1]} : vector<2x22x8xf32> to vector<2x16x8xf32>
    %9 = vector.extract_strided_slice %7 {offsets = [0, 1, 0], sizes = [2, 16, 8], strides = [1, 1, 1]} : vector<2x22x8xf32> to vector<2x16x8xf32>
    %10 = arith.addf %8, %9 : vector<2x16x8xf32>
    %11 = vector.extract_strided_slice %7 {offsets = [0, 2, 0], sizes = [2, 16, 8], strides = [1, 1, 1]} : vector<2x22x8xf32> to vector<2x16x8xf32>
    %12 = arith.addf %10, %11 : vector<2x16x8xf32>
    %13 = vector.extract_strided_slice %7 {offsets = [0, 3, 0], sizes = [2, 16, 8], strides = [1, 1, 1]} : vector<2x22x8xf32> to vector<2x16x8xf32>
    %14 = arith.addf %12, %13 : vector<2x16x8xf32>
    %15 = vector.extract_strided_slice %7 {offsets = [0, 4, 0], sizes = [2, 16, 8], strides = [1, 1, 1]} : vector<2x22x8xf32> to vector<2x16x8xf32>
    %16 = arith.addf %14, %15 : vector<2x16x8xf32>
    %17 = vector.extract_strided_slice %7 {offsets = [0, 5, 0], sizes = [2, 16, 8], strides = [1, 1, 1]} : vector<2x22x8xf32> to vector<2x16x8xf32>
    %18 = arith.addf %16, %17 : vector<2x16x8xf32>
    %19 = vector.extract_strided_slice %7 {offsets = [0, 6, 0], sizes = [2, 16, 8], strides = [1, 1, 1]} : vector<2x22x8xf32> to vector<2x16x8xf32>
    %20 = arith.addf %18, %19 : vector<2x16x8xf32>
    %cst = arith.constant 0.142857149 : f32
    %21 = vector.broadcast %cst : f32 to vector<2x16x8xf32>
    %22 = arith.mulf %20, %21 : vector<2x16x8xf32>
    %c0_2 = arith.constant 0 : index
    %c0_3 = arith.constant 0 : index
    %c0_4 = arith.constant 0 : index
    %23 = vector.load %arg2[%c0_2, %c0_3, %c0_4] : memref<2x16x8xf32, #tpu.memory_space<vmem>>, vector<2x16x8xf32>
    tpu.vector_store %arg2[%c0_2, %c0_3, %c0_4], %22 {strides = array<i32>} : memref<2x16x8xf32, #tpu.memory_space<vmem>>, vector<2x16x8xf32>,
    return
  }
  func.func @transform_0(%arg0: i32) -> (i32, i32, i32) {
    %c0_i32 = arith.constant 0 : i32
    %c0_i32_0 = arith.constant 0 : i32
    %c0_i32_1 = arith.constant 0 : i32
    return %arg0, %c0_i32, %c0_i32_0 : i32, i32, i32
  }
  func.func @transform_1(%arg0: i32) -> (i32, i32, i32) {
    %c0_i32 = arith.constant 0 : i32
    %c0_i32_0 = arith.constant 0 : i32
    %c0_i32_1 = arith.constant 0 : i32
    return %arg0, %c0_i32, %c0_i32_0 : i32, i32, i32
  }
}

</mosaic_0001>

<bundles_post_ra>
// kernel: tpu_custom_call.1
= control target key start
LH: loop header
LB: loop body
LE: loop exit
PB: predicated region body
PF: predicated region fallthrough
CT: control target
= control target key end

     0   :  { %s391_s6 = smov 0   ;;  %s481_s0 = inlined_call_operand.vmem [shape: f32[4,16,8], index: 0, kind: input, shape index: {}]   ;;  %s482_s1 = inlined_call_operand.vmem [shape: f32[4,16,8], index: 1, kind: output, shape index: {}]  }
   0x1 LB: > { %s350_s7 = sadd.s32 4294967295, %s379_s6   ;;  %p354_p0 = scmp.ge.s32.totalorder %s379_s6, 1  ;;  %s379_s6 = sphi %s391_s6, %s11_s6  }
   0x2   : > { %p89_p1 = scmp.lt.s32.totalorder %s379_s6, 3 }
   0x4   : > { %p90_p2 = pnand %p354_p0, %p89_p1 }
   0x5   : > { %s355_s8 = sshll.u32 (!%p90_p2), %s350_s7, 1 }
   0x6   : > { %93 = sbr.rel (%p90_p2) target bundleno = 52 (0x34), region = 24  ;;  %p112_p3 = scmp.lt.s32.totalorder (!%p90_p2), %s355_s8, 3 }
   0xb   : > { %v129_v0 = vlaneseq  ;;  %s484_s8 = smov (!%p112_p3, %s355_s8), 3  ;;  %vm149_vm0 = vcmask 1042432   ;;  %vm170_vm1 = vcmask 1046528   ;;  %vm189_vm2 = vcmask 1045504  }
   0xc   : > { %s363_s9 = sshll.u32 %s484_s8, 4  ;;  %vm208_vm3 = vcmask 1044480   ;;  %vm227_vm4 = vcmask 1043456   ;;  %vm264_vm5 = vcmask 1041408   ;;  %vm287_vm6 = vcmask 64512  }
   0xd   : > { %v130_v1 = vshrl.u32 %v129_v0, 7  ;;  %s116_s12 = scalar_lea.vmem %s481_s0, %s363_s9  ;;  %s450_s15 = scalar_lea.vmem %s482_s1, %s363_s9 }
   0xe   : > { %v125_v4 = vld [vmem:[%s116_s12] sm:$0xff]  ;;  %v126_v5 = vld [vmem:[%s116_s12 + $0x8] sm:$0xff]  ;;  %v127_v6 = vld [vmem:[%s116_s12 + $0x10] sm:$0xff] }
   0xf   : > { %v131_v2 = vsub.s32 0, %v130_v1  ;;  %v139_v3 = vsub.s32 7, %v130_v1  ;;  %v128_v7 = vld [vmem:[%s116_s12 + $0x18] sm:$0xff]  ;;  %v150_v11 = vrot.slane %v125_v4, 5  ;;  %v151_v12 = vrot.slane %v126_v5, 5 }
  0x10   : > { %v153_v13 = vrot.slane %v127_v6, 5  ;;  %v154_v14 = vrot.slane %v128_v7, 5 }
  0x11   : > { %v132_v8 = vrot.slane %v125_v4, %v131_v2  ;;  %v136_v9 = vrot.slane %v127_v6, %v131_v2  ;;  %v140_v10 = vrot.slane %v126_v5, %v139_v3  ;;  %v144_v16 = vrot.slane %v128_v7, %v139_v3 }
  0x12   : > { %v152_v17 = vsel %vm149_vm0, %v150_v11, %v151_v12  ;;  %v410_v18 = vsel %vm149_vm0, %v153_v13, %v154_v14 }
  0x13   : > { %v162_v15 = vsel %vm149_vm0, %v132_v8, %v150_v11  ;;  %v413_v19 = vsel %vm149_vm0, %v136_v9, %v153_v13  ;;  %v164_v20 = vsel %vm149_vm0, %v151_v12, %v140_v10  ;;  %v172_v22 = vrot.slane %v152_v17, 1 }
  0x14   : > { %v171_v21 = vrot.slane %v162_v15, 1  ;;  %v190_v23 = vrot.slane %v162_v15, 2  ;;  %v191_v24 = vrot.slane %v152_v17, 2  ;;  %v209_v25 = vrot.slane %v162_v15, 3 }
  0x15   : > { %v210_v26 = vrot.slane %v152_v17, 3  ;;  %v228_v27 = vrot.slane %v162_v15, 4  ;;  %v229_v29 = vrot.slane %v152_v17, 4  ;;  %v246_v30 = vrot.slane %v162_v15, 5 }
  0x16   : > { %v173_v28 = vsel %vm170_vm1, %v171_v21, %v172_v22  ;;  %v247_v31 = vrot.slane %v152_v17, 5  ;;  %v418_v32 = vsel %vm149_vm0, %v154_v14, %v144_v16  ;;  %v192_v34 = vsel %vm189_vm2, %v190_v23, %v191_v24 }
  0x17   : > { %v185_v33 = vadd.f32 %v173_v28, %v162_v15  ;;  %v265_v35 = vrot.slane %v162_v15, 6  ;;  %v211_v36 = vsel %vm208_vm3, %v209_v25, %v210_v26  ;;  %v230_v37 = vsel %vm227_vm4, %v228_v27, %v229_v29 }
  0x18   : > { %v266_v38 = vrot.slane %v152_v17, 6  ;;  %v174_v39 = vrot.slane %v164_v20, 1  ;;  %v193_v41 = vrot.slane %v164_v20, 2  ;;  %v212_v42 = vrot.slane %v164_v20, 3 }
  0x19   : > { %v204_v40 = vadd.f32 %v192_v34, %v185_v33  ;;  %v231_v43 = vrot.slane %v164_v20, 4  ;;  %v248_v44 = vsel %vm149_vm0, %v246_v30, %v247_v31  ;;  %v249_v47 = vrot.slane %v164_v20, 5 }
  0x1a   : > { %v267_v45 = vsel %vm264_vm5, %v265_v35, %v266_v38  ;;  %v175_v46 = vsel %vm170_vm1, %v172_v22, %v174_v39  ;;  %v194_v50 = vsel %vm189_vm2, %v191_v24, %v193_v41  ;;  %v268_v51 = vrot.slane %v164_v20, 6 }
  0x1b   : > { %v223_v48 = vadd.f32 %v211_v36, %v204_v40  ;;  %v186_v49 = vadd.f32 %v175_v46, %v152_v17  ;;  %v213_v52 = vsel %vm208_vm3, %v210_v26, %v212_v42  ;;  %v232_v53 = vsel %vm227_vm4, %v229_v29, %v231_v43 }
  0x1c   : > { %v250_v54 = vsel %vm149_vm0, %v247_v31, %v249_v47  ;;  %v176_v55 = vrot.slane %v413_v19, 1  ;;  %v177_v58 = vrot.slane %v410_v18, 1  ;;  %v195_v59 = vrot.slane %v413_v19, 2 }
  0x1d   : > { %v242_v56 = vadd.f32 %v230_v37, %v223_v48  ;;  %v205_v57 = vadd.f32 %v194_v50, %v186_v49  ;;  %v196_v60 = vrot.slane %v410_v18, 2  ;;  %v214_v61 = vrot.slane %v413_v19, 3 }
  0x1e   : > { %v215_v62 = vrot.slane %v410_v18, 3  ;;  %v233_v63 = vrot.slane %v413_v19, 4  ;;  %v178_v2 = vsel %vm170_vm1, %v176_v55, %v177_v58  ;;  %v234_v3 = vrot.slane %v410_v18, 4 }
  0x1f   : > { %v260_v0 = vadd.f32 %v248_v44, %v242_v56  ;;  %v224_v1 = vadd.f32 %v213_v52, %v205_v57  ;;  %v269_v4 = vsel %vm264_vm5, %v266_v38, %v268_v51  ;;  %v187_v5 = vadd.f32 %v178_v2, %v413_v19 }
  0x20   : > { %v197_v6 = vsel %vm189_vm2, %v195_v59, %v196_v60  ;;  %v251_v7 = vrot.slane %v413_v19, 5  ;;  %v216_v10 = vsel %vm208_vm3, %v214_v61, %v215_v62  ;;  %v252_v11 = vrot.slane %v410_v18, 5 }
  0x21   : > { %v279_v8 = vadd.f32 %v267_v45, %v260_v0  ;;  %v243_v9 = vadd.f32 %v232_v53, %v224_v1  ;;  %v206_v12 = vadd.f32 %v197_v6, %v187_v5  ;;  %v235_v13 = vsel %vm227_vm4, %v233_v63, %v234_v3 }
  0x22   : > { %v270_v14 = vrot.slane %v413_v19, 6  ;;  %v179_v15 = vrot.slane %v418_v32, 1  ;;  %v271_v20 = vrot.slane %v410_v18, 6  ;;  %v198_v21 = vrot.slane %v418_v32, 2 }
  0x23   : > { %v283_v16 = vmul.f32 0.14285715, %v279_v8  ;;  %v261_v17 = vadd.f32 %v250_v54, %v243_v9  ;;  %v225_v22 = vadd.f32 %v216_v10, %v206_v12  ;;  %v253_v23 = vsel %vm149_vm0, %v251_v7, %v252_v11 }
  0x24   : > { %v180_v24 = vsel %vm170_vm1, %v177_v58, %v179_v15  ;;  %v217_v25 = vrot.slane %v418_v32, 3  ;;  %v199_v27 = vsel %vm189_vm2, %v196_v60, %v198_v21  ;;  %v236_v28 = vrot.slane %v418_v32, 4 }
  0x25   : > { %288 = vst.msk [vmem:[%s450_s15] sm:$0xff] %vm287_vm6, %v283_v16  ;;  %v280_v26 = vadd.f32 %v269_v4, %v261_v17  ;;  %v188_v19 = vadd.f32 %v180_v24, %v410_v18  ;;  %v244_v29 = vadd.f32 %v235_v13, %v225_v22  ;;  %v254_v31 = vrot.slane %v418_v32, 5 }
  0x26   : > { %v218_v30 = vsel %vm208_vm3, %v215_v62, %v217_v25  ;;  %v272_v34 = vsel %vm264_vm5, %v270_v14, %v271_v20  ;;  %v237_v37 = vsel %vm227_vm4, %v234_v3, %v236_v28  ;;  %v273_v18 = vrot.slane %v418_v32, 6 }
  0x27   : > { %v284_v33 = vmul.f32 0.14285715, %v280_v26  ;;  %v207_v35 = vadd.f32 %v199_v27, %v188_v19  ;;  %v262_v36 = vadd.f32 %v253_v23, %v244_v29  ;;  %v255_v40 = vsel %vm149_vm0, %v252_v11, %v254_v31 }
  0x28   : > { %v274_v43 = vsel %vm264_vm5, %v271_v20, %v273_v18 }
  0x29   : > { %289 = vst.msk [vmem:[%s450_s15 + $0x8] sm:$0xff] %vm287_vm6, %v284_v33  ;;  %v226_v38 = vadd.f32 %v218_v30, %v207_v35  ;;  %v281_v39 = vadd.f32 %v272_v34, %v262_v36 }
  0x2b   : > { %v245_v41 = vadd.f32 %v237_v37, %v226_v38  ;;  %v285_v42 = vmul.f32 0.14285715, %v281_v39 }
  0x2d   : > { %v263_v44 = vadd.f32 %v255_v40, %v245_v41  ;;  %290 = vst.msk [vmem:[%s450_s15 + $0x10] sm:$0xff] %vm287_vm6, %v285_v42 }
  0x2f   : > { %v282_v45 = vadd.f32 %v274_v43, %v263_v44 }
  0x31   : > { %v286_v46 = vmul.f32 0.14285715, %v282_v45 }
  0x33   : > { %291 = vst.msk [vmem:[%s450_s15 + $0x18] sm:$0xff] %vm287_vm6, %v286_v46 }
  0x34 PF: > { %s11_s6 = sadd.s32 1, %s379_s6  }
  0x35   : > { %p8_p4 = scmp.ge.s32.totalorder %s11_s6, 4  }
  0x37   :  { %10 = sbr.rel (!%p8_p4) target bundleno = 1 (0x1), region = 54 }

</bundles_post_ra>
